<compile_context>
chip_gen: v6e
topology: v6e:2x2x1
jax: 0.10.0
libtpu: 0.0.40
codegen_flags: <defaults>
</compile_context>

<pallas_src>
import jax
import jax.numpy as jnp
from jax.experimental import pallas as pl
from jax.experimental.pallas import tpu as pltpu

# Fixed, non-trainable Sobel taps (requires_grad=False in the torch module).
KERNEL_X = jnp.array([[-1.0, 0.0, 1.0],
                      [-2.0, 0.0, 2.0],
                      [-1.0, 0.0, 1.0]], dtype=jnp.float32)
KERNEL_Y = jnp.array([[ 1.0,  2.0,  1.0],
                      [ 0.0,  0.0,  0.0],
                      [-1.0, -2.0, -1.0]], dtype=jnp.float32)


def _sobelxy_kernel(x_ref, o_ref):
    """x_ref/o_ref: (TB, Hp, Wp) blocks; last two dims are full padded planes."""
    x = x_ref[...]                       # (TB, Hp, Wp) float32
    _, Hp, Wp = x.shape

    row = jax.lax.broadcasted_iota(jnp.int32, x.shape, 1)
    col = jax.lax.broadcasted_iota(jnp.int32, x.shape, 2)

    # Horizontal neighbours with zero padding at the plane edges.
    # roll(x, 1)      -> x[..., j-1] (wrap at j=0      -> masked to 0)
    # roll(x, Wp - 1) -> x[..., j+1] (wrap at j=Wp-1   -> masked to 0)
    x_left = jnp.where(col == 0, 0.0, pltpu.roll(x, shift=1, axis=2))
    x_right = jnp.where(col == Wp - 1, 0.0, pltpu.roll(x, shift=Wp - 1, axis=2))

    # Separable per-row terms (computed once, reused for both filters).
    hdiff = x_right - x_left                  # row term of Sobel-x
    hsum = x_left + 2.0 * x + x_right         # row term of Sobel-y

    def up(a):    # a[:, i-1, :], zero at i == 0
        return jnp.where(row == 0, 0.0, pltpu.roll(a, shift=1, axis=1))

    def down(a):  # a[:, i+1, :], zero at i == Hp-1
        return jnp.where(row == Hp - 1, 0.0, pltpu.roll(a, shift=Hp - 1, axis=1))

    sobelx = up(hdiff) + 2.0 * hdiff + down(hdiff)
    sobely = up(hsum) - down(hsum)

    o_ref[...] = jnp.abs(sobelx) + jnp.abs(sobely)


def _round_up(v, m):
    return (v + m - 1) // m * m


def _choose_block_planes(B, Hp, Wp, itemsize, vmem_budget_bytes=16 * 1024 * 1024):
    """Largest divisor of B whose block (in + out, double-buffered, temporaries)
    stays well inside the smallest (v7x) VMEM budget."""
    plane_bytes = Hp * Wp * itemsize
    max_tb = max(1, vmem_budget_bytes // (10 * plane_bytes))
    tb = 1
    for d in range(1, B + 1):
        if B % d == 0 and d <= max_tb:
            tb = d
    return tb


def _sobelxy_impl(x):
    """x: (N, 1, H, W) float32 -> (N, 1, H, W) float32."""
    N, C, H, W = x.shape
    assert C == 1, "Sobelxy conv weights have in_channels=1"
    B = N * C

    planes = x.reshape(B, H, W)

    # Lane/sublane alignment padding (skipped entirely when already aligned).
    Hp = _round_up(H, 8)
    Wp = _round_up(W, 128)
    if (Hp, Wp) != (H, W):
        planes = jnp.pad(planes, ((0, 0), (0, Hp - H), (0, Wp - W)))

    TB = _choose_block_planes(B, Hp, Wp, jnp.dtype(planes.dtype).itemsize)

    out = pl.pallas_call(
        _sobelxy_kernel,
        out_shape=jax.ShapeDtypeStruct((B, Hp, Wp), planes.dtype),
        grid_spec=pltpu.PrefetchScalarGridSpec(
            num_scalar_prefetch=0,
            grid=(B // TB,),
            in_specs=[pl.BlockSpec((TB, Hp, Wp), lambda b: (b, 0, 0))],
            out_specs=pl.BlockSpec((TB, Hp, Wp), lambda b: (b, 0, 0)),
        ),
        compiler_params=pltpu.CompilerParams(
            dimension_semantics=("parallel",)),
    )(planes)

    if (Hp, Wp) != (H, W):
        out = out[:, :H, :W]
    return out.reshape(N, C, H, W)


sobelxy = jax.jit(_sobelxy_impl)


def _reference(x):
    """Plain-JAX reference (lax.conv) for a sanity check."""
    wx = KERNEL_X.reshape(1, 1, 3, 3)
    wy = KERNEL_Y.reshape(1, 1, 3, 3)
    dn = jax.lax.conv_dimension_numbers(x.shape, wx.shape, ("NCHW", "OIHW", "NCHW"))
    sx = jax.lax.conv_general_dilated(x, wx, (1, 1), ((1, 1), (1, 1)),
                                      dimension_numbers=dn)
    sy = jax.lax.conv_general_dilated(x, wy, (1, 1), ((1, 1), (1, 1)),
                                      dimension_numbers=dn)
    return jnp.abs(sx) + jnp.abs(sy)


if __name__ == "__main__":
    key = jax.random.PRNGKey(0)

    # Primary shape consistent with the module: batch=2, channels=1, spatial=16.
    x = jax.random.normal(key, (2, 1, 16, 16), dtype=jnp.float32)
    out = jax.block_until_ready(sobelxy(x))
    ref = _reference(x)
    assert out.shape == (2, 1, 16, 16)
    assert jnp.allclose(out, ref, atol=1e-5, rtol=1e-5)

    # Exercise the already-lane-aligned (no pad / no slice) fast path.
    x2 = jax.random.normal(jax.random.PRNGKey(1), (2, 1, 24, 128), dtype=jnp.float32)
    out2 = jax.block_until_ready(sobelxy(x2))
    assert jnp.allclose(out2, _reference(x2), atol=1e-5, rtol=1e-5)

    # Exercise row padding (H not a multiple of 8) + column padding.
    x3 = jax.random.normal(jax.random.PRNGKey(2), (1, 1, 13, 20), dtype=jnp.float32)
    out3 = jax.block_until_ready(sobelxy(x3))
    assert jnp.allclose(out3, _reference(x3), atol=1e-5, rtol=1e-5)

    print("KERNEL_OK")
</pallas_src>

<mosaic_0001>
module attributes {stable_mosaic.version = 11 : i64} {
  func.func @_sobelxy_kernel(%arg0: i32, %arg1: memref<2x16x128xf32, #tpu.memory_space<vmem>>, %arg2: memref<2x16x128xf32, #tpu.memory_space<vmem>>) attributes {dimension_semantics = [#tpu.dimension_semantics<parallel>], iteration_bounds = array<i64: 1>, scalar_prefetch = 0 : i64, scratch_operands = 0 : i64, tpu.core_type = #tpu.core_type<tc>, window_params = [{transform_indices = @transform_0, window_bounds = array<i64: 2, 16, 128>}, {transform_indices = @transform_1, window_bounds = array<i64: 2, 16, 128>}]} {
    %c0 = arith.constant 0 : index
    %c0_0 = arith.constant 0 : index
    %c0_1 = arith.constant 0 : index
    %0 = vector.load %arg1[%c0, %c0_0, %c0_1] : memref<2x16x128xf32, #tpu.memory_space<vmem>>, vector<2x16x128xf32>
    %1 = tpu.iota {dimensions = array<i32: 1>} : vector<2x16x128xi32>
    %2 = tpu.iota {dimensions = array<i32: 2>} : vector<2x16x128xi32>
    %c0_i32 = arith.constant 0 : i32
    %3 = vector.broadcast %c0_i32 : i32 to vector<2x16x128xi32>
    %4 = arith.cmpi eq, %2, %3 : vector<2x16x128xi32>
    %c1_i32 = arith.constant 1 : i32
    %5 = tpu.dynamic_rotate %0 by %c1_i32 dim 2 : vector<2x16x128xf32>, i32 -> vector<2x16x128xf32>
    %cst = arith.constant 0.000000e+00 : f32
    %6 = vector.broadcast %cst : f32 to vector<2x16x128xf32>
    %7 = arith.select %4, %6, %5 : vector<2x16x128xi1>, vector<2x16x128xf32>
    %c127_i32 = arith.constant 127 : i32
    %8 = vector.broadcast %c127_i32 : i32 to vector<2x16x128xi32>
    %9 = arith.cmpi eq, %2, %8 : vector<2x16x128xi32>
    %c127_i32_2 = arith.constant 127 : i32
    %10 = tpu.dynamic_rotate %0 by %c127_i32_2 dim 2 : vector<2x16x128xf32>, i32 -> vector<2x16x128xf32>
    %cst_3 = arith.constant 0.000000e+00 : f32
    %11 = vector.broadcast %cst_3 : f32 to vector<2x16x128xf32>
    %12 = arith.select %9, %11, %10 : vector<2x16x128xi1>, vector<2x16x128xf32>
    %13 = arith.subf %12, %7 : vector<2x16x128xf32>
    %cst_4 = arith.constant 2.000000e+00 : f32
    %14 = vector.broadcast %cst_4 : f32 to vector<2x16x128xf32>
    %15 = arith.mulf %14, %0 : vector<2x16x128xf32>
    %16 = arith.addf %7, %15 : vector<2x16x128xf32>
    %17 = arith.addf %16, %12 : vector<2x16x128xf32>
    %c0_i32_5 = arith.constant 0 : i32
    %18 = vector.broadcast %c0_i32_5 : i32 to vector<2x16x128xi32>
    %19 = arith.cmpi eq, %1, %18 : vector<2x16x128xi32>
    %c1_i32_6 = arith.constant 1 : i32
    %20 = tpu.dynamic_rotate %13 by %c1_i32_6 dim 1 : vector<2x16x128xf32>, i32 -> vector<2x16x128xf32>
    %cst_7 = arith.constant 0.000000e+00 : f32
    %21 = vector.broadcast %cst_7 : f32 to vector<2x16x128xf32>
    %22 = arith.select %19, %21, %20 : vector<2x16x128xi1>, vector<2x16x128xf32>
    %cst_8 = arith.constant 2.000000e+00 : f32
    %23 = vector.broadcast %cst_8 : f32 to vector<2x16x128xf32>
    %24 = arith.mulf %23, %13 : vector<2x16x128xf32>
    %25 = arith.addf %22, %24 : vector<2x16x128xf32>
    %c15_i32 = arith.constant 15 : i32
    %26 = vector.broadcast %c15_i32 : i32 to vector<2x16x128xi32>
    %27 = arith.cmpi eq, %1, %26 : vector<2x16x128xi32>
    %c15_i32_9 = arith.constant 15 : i32
    %28 = tpu.dynamic_rotate %13 by %c15_i32_9 dim 1 : vector<2x16x128xf32>, i32 -> vector<2x16x128xf32>
    %cst_10 = arith.constant 0.000000e+00 : f32
    %29 = vector.broadcast %cst_10 : f32 to vector<2x16x128xf32>
    %30 = arith.select %27, %29, %28 : vector<2x16x128xi1>, vector<2x16x128xf32>
    %31 = arith.addf %25, %30 : vector<2x16x128xf32>
    %c0_i32_11 = arith.constant 0 : i32
    %32 = vector.broadcast %c0_i32_11 : i32 to vector<2x16x128xi32>
    %33 = arith.cmpi eq, %1, %32 : vector<2x16x128xi32>
    %c1_i32_12 = arith.constant 1 : i32
    %34 = tpu.dynamic_rotate %17 by %c1_i32_12 dim 1 : vector<2x16x128xf32>, i32 -> vector<2x16x128xf32>
    %cst_13 = arith.constant 0.000000e+00 : f32
    %35 = vector.broadcast %cst_13 : f32 to vector<2x16x128xf32>
    %36 = arith.select %33, %35, %34 : vector<2x16x128xi1>, vector<2x16x128xf32>
    %c15_i32_14 = arith.constant 15 : i32
    %37 = vector.broadcast %c15_i32_14 : i32 to vector<2x16x128xi32>
    %38 = arith.cmpi eq, %1, %37 : vector<2x16x128xi32>
    %c15_i32_15 = arith.constant 15 : i32
    %39 = tpu.dynamic_rotate %17 by %c15_i32_15 dim 1 : vector<2x16x128xf32>, i32 -> vector<2x16x128xf32>
    %cst_16 = arith.constant 0.000000e+00 : f32
    %40 = vector.broadcast %cst_16 : f32 to vector<2x16x128xf32>
    %41 = arith.select %38, %40, %39 : vector<2x16x128xi1>, vector<2x16x128xf32>
    %42 = arith.subf %36, %41 : vector<2x16x128xf32>
    %43 = math.absf %31 : vector<2x16x128xf32>
    %44 = math.absf %42 : vector<2x16x128xf32>
    %45 = arith.addf %43, %44 : vector<2x16x128xf32>
    %c0_17 = arith.constant 0 : index
    %c0_18 = arith.constant 0 : index
    %c0_19 = arith.constant 0 : index
    %46 = vector.load %arg2[%c0_17, %c0_18, %c0_19] : memref<2x16x128xf32, #tpu.memory_space<vmem>>, vector<2x16x128xf32>
    tpu.vector_store %arg2[%c0_17, %c0_18, %c0_19], %45 {strides = array<i32>} : memref<2x16x128xf32, #tpu.memory_space<vmem>>, vector<2x16x128xf32>,
    return
  }
  func.func @transform_0(%arg0: i32) -> (i32, i32, i32) {
    %c0_i32 = arith.constant 0 : i32
    %c0_i32_0 = arith.constant 0 : i32
    %c0_i32_1 = arith.constant 0 : i32
    return %arg0, %c0_i32, %c0_i32_0 : i32, i32, i32
  }
  func.func @transform_1(%arg0: i32) -> (i32, i32, i32) {
    %c0_i32 = arith.constant 0 : i32
    %c0_i32_0 = arith.constant 0 : i32
    %c0_i32_1 = arith.constant 0 : i32
    return %arg0, %c0_i32, %c0_i32_0 : i32, i32, i32
  }
}

</mosaic_0001>

<bundles_post_ra>
// kernel: _sobelxy_impl.1
= control target key start
LH: loop header
LB: loop body
LE: loop exit
PB: predicated region body
PF: predicated region fallthrough
CT: control target
= control target key end

     0   :  { %s151_s10 = smov 1   ;;  %s152_s15 = smov 127   ;;  %v12_v4 = vlaneseq  ;;  %s252_s0 = inlined_call_operand.vmem [shape: f32[2,16,128], index: 0, kind: input, shape index: {}]   ;;  %s253_s1 = inlined_call_operand.vmem [shape: f32[2,16,128], index: 1, kind: output, shape index: {}]  }
   0x1   :  { %v10_v0 = vld [vmem:[%s252_s0 + $0x10] sm:$0xff]  ;;  %v8_v1 = vld [vmem:[%s252_s0] sm:$0xff]  ;;  %v11_v2 = vld [vmem:[%s252_s0 + $0x18] sm:$0xff] }
   0x2   :  { %22 = vrot.lane.b32.xlu1 %v10_v0, %s151_s10  ;;  %18 = vrot.lane.b32.xlu0 %v8_v1, %s151_s10  ;;  %v9_v3 = vld [vmem:[%s252_s0 + $0x8] sm:$0xff]  ;;  %v16_v5 = vand.u32 127, %v12_v4  ;;  %v175_v8 = vshrl.u32 %v12_v4, 7  ;;  %v47_v9 = vmul.f32 2.0, %v8_v1  ;;  %v50_v15 = vmul.f32 2.0, %v11_v2 }
   0x3   :  { %v48_v11 = vmul.f32 2.0, %v9_v3  ;;  %v49_v17 = vmul.f32 2.0, %v10_v0 }
   0x4   :  { %vm17_vm0 = vcmp.eq.s32.totalorder %v16_v5, 0  ;;  %vm30_vm1 = vcmp.eq.s32.totalorder %v16_v5, 127  ;;  %v180_v16 = vadd.s32 8, %v175_v8  ;;  %vm65_vm2 = vcmp.lt.s32.totalorder %v175_v8, 1 }
   0x5   :  { %vm88_vm3 = vcmp.lt.s32.totalorder %v175_v8, 7  ;;  %vm59_vm4 = vcmp.eq.s32.totalorder %v175_v8, 0 }
   0x6   :  { %24 = vrot.lane.b32.xlu1 %v11_v2, %s151_s10  ;;  %20 = vrot.lane.b32.xlu0 %v9_v3, %s151_s10  ;;  %vm83_vm5 = vcmp.eq.s32.totalorder %v180_v16, 15 }
   0xa   :  { %33 = vrot.lane.b32.xlu1 %v9_v3, %s152_s15  ;;  %31 = vrot.lane.b32.xlu0 %v8_v1, %s152_s15 }
   0xe   :  { %37 = vrot.lane.b32.xlu1 %v11_v2, %s152_s15  ;;  %35 = vrot.lane.b32.xlu0 %v10_v0, %s152_s15 }
  0x74   :  { %v23_v6 = vpop.permute.xlu1 %22  ;;  %v19_v7 = vpop.permute.xlu0 %18 }
  0x75   :  { %v26_v13 = vsel %vm17_vm0, 0.0, %v19_v7  ;;  %v28_v29 = vsel %vm17_vm0, 0.0, %v23_v6 }
  0x76   :  { %v51_v18 = vadd.f32 %v47_v9, %v26_v13  ;;  %v53_v1 = vadd.f32 %v49_v17, %v28_v29 }
  0x78   :  { %v25_v10 = vpop.permute.xlu1 %24  ;;  %v21_v12 = vpop.permute.xlu0 %20 }
  0x79   :  { %v27_v14 = vsel %vm17_vm0, 0.0, %v21_v12  ;;  %v29_v19 = vsel %vm17_vm0, 0.0, %v25_v10 }
  0x7a   :  { %v52_v20 = vadd.f32 %v48_v11, %v27_v14  ;;  %v54_v30 = vadd.f32 %v50_v15, %v29_v19 }
  0x7c   :  { %v34_v21 = vpop.permute.xlu1 %33  ;;  %v32_v22 = vpop.permute.xlu0 %31 }
  0x7d   :  { %v40_v23 = vsel %vm30_vm1, 0.0, %v34_v21  ;;  %v39_v24 = vsel %vm30_vm1, 0.0, %v32_v22 }
  0x7e   :  { %v44_v25 = vsub.f32 %v40_v23, %v27_v14  ;;  %v56_v26 = vadd.f32 %v52_v20, %v40_v23  ;;  %v43_v27 = vsub.f32 %v39_v24, %v26_v13  ;;  %v55_v28 = vadd.f32 %v51_v18, %v39_v24 }
  0x80   :  { %v63_v31 = vrot.slane %v44_v25, 7  ;;  %v75_v32 = vmul.f32 2.0, %v44_v25  ;;  %v86_v33 = vrot.slane %v44_v25, 1  ;;  %v103_v34 = vrot.slane %v56_v26, 7  ;;  %v38_v35 = vpop.permute.xlu1 %37  ;;  %v36_v36 = vpop.permute.xlu0 %35 }
  0x81   :  { %v115_v37 = vrot.slane %v56_v26, 1  ;;  %v61_v38 = vrot.slane %v43_v27, 7  ;;  %v74_v39 = vmul.f32 2.0, %v43_v27  ;;  %v84_v40 = vrot.slane %v43_v27, 1 }
  0x82   :  { %v101_v41 = vrot.slane %v55_v28, 7  ;;  %v113_v42 = vrot.slane %v55_v28, 1  ;;  %v42_v43 = vsel %vm30_vm1, 0.0, %v38_v35  ;;  %v41_v44 = vsel %vm30_vm1, 0.0, %v36_v36 }
  0x83   :  { %v66_v45 = vsel %vm65_vm2, %v61_v38, %v63_v31  ;;  %v68_v46 = vsel %vm65_vm2, %v63_v31, %v61_v38  ;;  %v89_v47 = vsel %vm88_vm3, %v84_v40, %v86_v33  ;;  %v91_v48 = vsel %vm88_vm3, %v86_v33, %v84_v40 }
  0x84   :  { %v70_v49 = vsel %vm59_vm4, 0.0, %v68_v46  ;;  %v79_v50 = vadd.f32 %v75_v32, %v66_v45  ;;  %v94_v51 = vsel %vm83_vm5, 0.0, %v91_v48  ;;  %v105_v52 = vsel %vm65_vm2, %v101_v41, %v103_v34 }
  0x85   :  { %v78_v53 = vadd.f32 %v74_v39, %v70_v49  ;;  %v107_v54 = vsel %vm65_vm2, %v103_v34, %v101_v41  ;;  %v117_v55 = vsel %vm88_vm3, %v113_v42, %v115_v37  ;;  %v119_v56 = vsel %vm88_vm3, %v115_v37, %v113_v42 }
  0x86   :  { %v98_v57 = vadd.f32 %v94_v51, %v79_v50  ;;  %v109_v58 = vsel %vm59_vm4, 0.0, %v107_v54  ;;  %v122_v59 = vsel %vm83_vm5, 0.0, %v119_v56  ;;  %v46_v60 = vsub.f32 %v42_v43, %v29_v19 }
  0x87   :  { %v97_v61 = vadd.f32 %v89_v47, %v78_v53  ;;  %v125_v62 = vsub.f32 %v109_v58, %v117_v55  ;;  %v126_v63 = vsub.f32 %v105_v52, %v122_v59  ;;  %v58_v0 = vadd.f32 %v54_v30, %v42_v43 }
  0x88   :  { %v130_v2 = vand.u32 2147483647, %v98_v57  ;;  %v64_v3 = vrot.slane %v46_v60, 7  ;;  %v45_v7 = vsub.f32 %v41_v44, %v28_v29  ;;  %v77_v9 = vmul.f32 2.0, %v46_v60 }
  0x89   :  { %v129_v4 = vand.u32 2147483647, %v97_v61  ;;  %v133_v5 = vand.u32 2147483647, %v125_v62  ;;  %v134_v6 = vand.u32 2147483647, %v126_v63  ;;  %v57_v11 = vadd.f32 %v53_v1, %v41_v44 }
  0x8a   :  { %v87_v10 = vrot.slane %v46_v60, 1  ;;  %v104_v14 = vrot.slane %v58_v0, 7  ;;  %v62_v15 = vrot.slane %v45_v7, 7  ;;  %v116_v18 = vrot.slane %v58_v0, 1 }
  0x8b   :  { %v137_v12 = vadd.f32 %v133_v5, %v129_v4  ;;  %v138_v13 = vadd.f32 %v134_v6, %v130_v2  ;;  %v85_v19 = vrot.slane %v45_v7, 1  ;;  %v102_v20 = vrot.slane %v57_v11, 7 }
  0x8c   :  { %v114_v21 = vrot.slane %v57_v11, 1  ;;  %v67_v17 = vsel %vm65_vm2, %v62_v15, %v64_v3  ;;  %v69_v22 = vsel %vm65_vm2, %v64_v3, %v62_v15  ;;  %v76_v23 = vmul.f32 2.0, %v45_v7 }
  0x8d   :  { %141 = vst [vmem:[%s253_s1] sm:$0xff] %v137_v12  ;;  %142 = vst [vmem:[%s253_s1 + $0x8] sm:$0xff] %v138_v13  ;;  %v72_v24 = vsel %vm59_vm4, 0.0, %v69_v22  ;;  %v81_v25 = vadd.f32 %v77_v9, %v67_v17  ;;  %v90_v26 = vsel %vm88_vm3, %v85_v19, %v87_v10  ;;  %v92_v27 = vsel %vm88_vm3, %v87_v10, %v85_v19 }
  0x8e   :  { %v80_v28 = vadd.f32 %v76_v23, %v72_v24  ;;  %v96_v29 = vsel %vm83_vm5, 0.0, %v92_v27  ;;  %v106_v30 = vsel %vm65_vm2, %v102_v20, %v104_v14  ;;  %v108_v31 = vsel %vm65_vm2, %v104_v14, %v102_v20 }
  0x8f   :  { %v100_v32 = vadd.f32 %v96_v29, %v81_v25  ;;  %v111_v33 = vsel %vm59_vm4, 0.0, %v108_v31  ;;  %v118_v34 = vsel %vm88_vm3, %v114_v21, %v116_v18  ;;  %v120_v35 = vsel %vm88_vm3, %v116_v18, %v114_v21 }
  0x90   :  { %v99_v36 = vadd.f32 %v90_v26, %v80_v28  ;;  %v124_v37 = vsel %vm83_vm5, 0.0, %v120_v35  ;;  %v127_v38 = vsub.f32 %v111_v33, %v118_v34 }
  0x91   :  { %v128_v39 = vsub.f32 %v106_v30, %v124_v37  ;;  %v132_v40 = vand.u32 2147483647, %v100_v32 }
  0x92   :  { %v131_v41 = vand.u32 2147483647, %v99_v36  ;;  %v135_v42 = vand.u32 2147483647, %v127_v38 }
  0x93   :  { %v136_v43 = vand.u32 2147483647, %v128_v39 }
  0x94   :  { %v139_v44 = vadd.f32 %v135_v42, %v131_v41 }
  0x95   :  { %v140_v45 = vadd.f32 %v136_v43, %v132_v40 }
  0x96   :  { %143 = vst [vmem:[%s253_s1 + $0x10] sm:$0xff] %v139_v44 }
  0x97   :  { %144 = vst [vmem:[%s253_s1 + $0x18] sm:$0xff] %v140_v45 }

</bundles_post_ra>
